<compile_context>
chip_gen: v7x
topology: tpu7x:2x2x1
jax: 0.10.0
libtpu: 0.0.40
codegen_flags: <defaults>
</compile_context>

<pallas_src>
import numpy as np
import jax
import jax.numpy as jnp
from jax.experimental import pallas as pl
from jax.experimental.pallas import tpu as pltpu

FIELD_DIMS = (10, 20, 30, 40)   # F = 4 fields, vocab = 100
NUM_FIELDS = len(FIELD_DIMS)
EMBED_DIM = 8                   # D
HIDDEN = (256, 128)
BN_EPS = 1e-5


def _round_up(x, m):
    return (x + m - 1) // m * m


# --------------------------- Pallas kernel ---------------------------------
def deepfm_kernel(flat_ref, lin_ref, w1_ref, b1_ref, w2_ref, b2_ref, w3_ref,
                  out_ref):
    """One batch tile of DeepFM.

    flat_ref : (TB, F*D) bf16   flattened field embeddings
    lin_ref  : (TB, 1)   f32    FeaturesLinear term + lin_bias + b3 (wrapper)
    w1_ref   : (F*D, H1) bf16   BN1-folded
    b1_ref   : (1, H1)   f32    BN1-folded
    w2_ref   : (H1, H2)  bf16   BN2-folded
    b2_ref   : (1, H2)   f32    BN2-folded
    w3_ref   : (1, H2)   f32    final Linear weight as a lane row
    out_ref  : (TB, 1)   f32
    """
    flat_bf = flat_ref[...]                              # (TB, F*D) bf16
    flat = flat_bf.astype(jnp.float32)                   # f32 for FM / VPU math

    # ---- Factorization Machine from the flat layout (static lane slices) ----
    # 0.5 * sum_d[(sum_f e)^2] - 0.5 * sum_{f,d}[e^2]
    sum_f = flat[:, 0:EMBED_DIM]
    for f in range(1, NUM_FIELDS):
        sum_f = sum_f + flat[:, f * EMBED_DIM:(f + 1) * EMBED_DIM]
    square_of_sum = jnp.sum(sum_f * sum_f, axis=-1, keepdims=True)     # (TB, 1)
    sum_of_square = jnp.sum(flat * flat, axis=-1, keepdims=True)       # (TB, 1)
    fm_logit = jax.nn.sigmoid(0.5 * (square_of_sum - sum_of_square))   # (TB, 1)

    # ---- DNN: Linear(+folded BN) -> ReLU -> Linear(+folded BN) -> ReLU ----
    h1 = jnp.dot(flat_bf, w1_ref[...],
                 preferred_element_type=jnp.float32) + b1_ref[...]
    h1 = jnp.maximum(h1, 0.0)                                          # (TB, H1)
    h2 = jnp.dot(h1.astype(jnp.bfloat16), w2_ref[...],
                 preferred_element_type=jnp.float32) + b2_ref[...]
    h2 = jnp.maximum(h2, 0.0)                                          # (TB, H2)

    # Final H2->1 layer as VPU multiply + lane reduce (avoid N=1 MXU matmul).
    dnn_logit = jnp.sum(h2 * w3_ref[...], axis=-1, keepdims=True)      # (TB, 1)

    # lin_ref already contains linear term + lin_bias + b3 (folded in wrapper).
    # Output last-dim is 1 (masked lane store) but only 4 B/row -> negligible.
    out_ref[...] = jax.nn.sigmoid(lin_ref[...] + fm_logit + dnn_logit)


# --------------------------- parameter setup --------------------------------
def init_params(key):
    F = NUM_FIELDS
    V = int(np.sum(FIELD_DIMS))
    D = EMBED_DIM
    in_dim = F * D
    ks = jax.random.split(key, 8)

    def dense(k, fan_in, shape):
        bound = 1.0 / np.sqrt(fan_in)
        return jax.random.uniform(k, shape, jnp.float32, -bound, bound)

    return dict(
        emb_table=jax.random.normal(ks[0], (V, D), jnp.float32) * 0.01,
        lin_table=jax.random.normal(ks[1], (V, 1), jnp.float32) * 0.01,
        lin_bias=jnp.zeros((1, 1), jnp.float32),
        w1=dense(ks[2], in_dim, (in_dim, HIDDEN[0])),
        b1=dense(ks[3], in_dim, (1, HIDDEN[0])),
        w2=dense(ks[4], HIDDEN[0], (HIDDEN[0], HIDDEN[1])),
        b2=dense(ks[5], HIDDEN[0], (1, HIDDEN[1])),
        w3=dense(ks[6], HIDDEN[1], (HIDDEN[1], 1)),
        b3=dense(ks[7], HIDDEN[1], (1, 1)),
        # BatchNorm1d at init / eval: gamma=1, beta=0, mean=0, var=1
        bn1_scale=jnp.full((1, HIDDEN[0]), 1.0 / np.sqrt(1.0 + BN_EPS), jnp.float32),
        bn1_shift=jnp.zeros((1, HIDDEN[0]), jnp.float32),
        bn2_scale=jnp.full((1, HIDDEN[1]), 1.0 / np.sqrt(1.0 + BN_EPS), jnp.float32),
        bn2_shift=jnp.zeros((1, HIDDEN[1]), jnp.float32),
    )


def prepare_params(params):
    """Fold eval-mode BatchNorm into the dense weights and cast big operands
    to bf16.  Done once, outside the hot path."""
    s1, sh1 = params["bn1_scale"], params["bn1_shift"]
    s2, sh2 = params["bn2_scale"], params["bn2_shift"]
    return dict(
        emb_table=params["emb_table"],
        lin_table=params["lin_table"],
        lin_bias=params["lin_bias"],
        w1=(params["w1"] * s1).astype(jnp.bfloat16),
        b1=params["b1"] * s1 + sh1,
        w2=(params["w2"] * s2).astype(jnp.bfloat16),
        b2=params["b2"] * s2 + sh2,
        w3_row=params["w3"].reshape(1, HIDDEN[1]),   # (1, H2) f32
        b3=params["b3"],                             # (1, 1)  f32
    )


# --------------------------- wrapper -----------------------------------------
def deepfm_forward(prep, x, block_b=None):
    """x: (B, F) int32 per-field indices. Returns (B,) float32 probabilities."""
    B, F = x.shape
    D = EMBED_DIM
    FD = F * D
    H1, H2 = HIDDEN

    offsets = jnp.asarray(
        np.concatenate([[0], np.cumsum(FIELD_DIMS)[:-1]]), jnp.int32)
    idx = x + offsets[None, :]                               # (B, F) global ids

    # Embedding gathers (glue, plain JAX).  bf16 halves the dominant HBM bytes.
    flat = prep["emb_table"][idx].reshape(B, FD).astype(jnp.bfloat16)  # (B, F*D)
    # FeaturesLinear + its bias + final dense bias, folded outside the kernel.
    lin = (jnp.sum(prep["lin_table"][idx][..., 0], axis=1, keepdims=True)
           + prep["lin_bias"] + prep["b3"])                            # (B, 1)

    # Batch tile: multiple of 16 (bf16 sublane packing).  512 fits v7x's 64 MiB
    # VMEM comfortably; on v5e/v6e (128 MiB) 2048+ also works.
    if block_b is None:
        block_b = 512
    TB = min(_round_up(B, 16), _round_up(block_b, 16))
    Bp = _round_up(B, TB)
    if Bp != B:
        flat = jnp.pad(flat, ((0, Bp - B), (0, 0)))
        lin = jnp.pad(lin, ((0, Bp - B), (0, 0)))

    grid = (Bp // TB,)
    cost = pl.CostEstimate(
        flops=2 * Bp * (FD * H1 + H1 * H2 + H2) + 6 * Bp * FD,
        transcendentals=2 * Bp,
        bytes_accessed=(Bp * (FD * 2 + 4 + 4)
                        + (FD * H1 + H1 * H2) * 2
                        + (H1 + 2 * H2 + 1) * 4),
    )

    out = pl.pallas_call(
        deepfm_kernel,
        out_shape=jax.ShapeDtypeStruct((Bp, 1), jnp.float32),
        grid=grid,
        in_specs=[
            pl.BlockSpec((TB, FD), lambda i: (i, 0)),    # flat (per batch tile)
            pl.BlockSpec((TB, 1), lambda i: (i, 0)),     # lin  (per batch tile)
            pl.BlockSpec((FD, H1), lambda i: (0, 0)),    # w1 (VMEM-resident)
            pl.BlockSpec((1, H1), lambda i: (0, 0)),     # b1
            pl.BlockSpec((H1, H2), lambda i: (0, 0)),    # w2
            pl.BlockSpec((1, H2), lambda i: (0, 0)),     # b2
            pl.BlockSpec((1, H2), lambda i: (0, 0)),     # w3 row
        ],
        out_specs=pl.BlockSpec((TB, 1), lambda i: (i, 0)),
        compiler_params=pltpu.CompilerParams(
            dimension_semantics=("parallel",)),
        cost_estimate=cost,
    )(flat, lin, prep["w1"], prep["b1"], prep["w2"], prep["b2"], prep["w3_row"])

    return out[:B, 0]


# --------------------------- references --------------------------------------
def deepfm_reference_f32(params, x):
    """Exact f32 eval-mode semantics of the PyTorch module."""
    B, F = x.shape
    offsets = jnp.asarray(
        np.concatenate([[0], np.cumsum(FIELD_DIMS)[:-1]]), jnp.int32)
    idx = x + offsets[None, :]
    emb = params["emb_table"][idx]
    lin_logit = jnp.sum(params["lin_table"][idx][..., 0], axis=1, keepdims=True) \
        + params["lin_bias"]
    sum_f = jnp.sum(emb, axis=1)
    fm = 0.5 * jnp.sum(sum_f ** 2 - jnp.sum(emb ** 2, axis=1), axis=1, keepdims=True)
    fm_logit = jax.nn.sigmoid(fm)
    h = emb.reshape(B, -1)
    h = jnp.maximum((h @ params["w1"] + params["b1"]) * params["bn1_scale"]
                    + params["bn1_shift"], 0.0)
    h = jnp.maximum((h @ params["w2"] + params["b2"]) * params["bn2_scale"]
                    + params["bn2_shift"], 0.0)
    dnn_logit = h @ params["w3"] + params["b3"]
    return jax.nn.sigmoid(lin_logit + fm_logit + dnn_logit)[:, 0]


def deepfm_reference_matched(prep, x):
    """Pure-JAX reference using the same folded/bf16 parameters as the kernel."""
    B, F = x.shape
    D = EMBED_DIM
    offsets = jnp.asarray(
        np.concatenate([[0], np.cumsum(FIELD_DIMS)[:-1]]), jnp.int32)
    idx = x + offsets[None, :]
    flat_bf = prep["emb_table"][idx].reshape(B, F * D).astype(jnp.bfloat16)
    flat = flat_bf.astype(jnp.float32)
    lin = (jnp.sum(prep["lin_table"][idx][..., 0], axis=1, keepdims=True)
           + prep["lin_bias"] + prep["b3"])
    e = flat.reshape(B, F, D)
    fm = 0.5 * jnp.sum(jnp.sum(e, axis=1) ** 2 - jnp.sum(e ** 2, axis=1),
                       axis=1, keepdims=True)
    fm_logit = jax.nn.sigmoid(fm)
    h1 = jnp.maximum(jnp.dot(flat_bf, prep["w1"],
                             preferred_element_type=jnp.float32) + prep["b1"], 0.0)
    h2 = jnp.maximum(jnp.dot(h1.astype(jnp.bfloat16), prep["w2"],
                             preferred_element_type=jnp.float32) + prep["b2"], 0.0)
    dnn = jnp.sum(h2 * prep["w3_row"], axis=-1, keepdims=True)
    return jax.nn.sigmoid(lin + fm_logit + dnn)[:, 0]


if __name__ == "__main__":
    key = jax.random.PRNGKey(0)
    pkey, xkey = jax.random.split(key)
    params = init_params(pkey)
    prep = prepare_params(params)

    B, F = 8, NUM_FIELDS
    # One index per field, within that field's cardinality.
    maxvals = jnp.asarray(FIELD_DIMS, jnp.int32)[None, :]
    x = (jax.random.randint(xkey, (B, F), 0, 10_000, jnp.int32) % maxvals).astype(jnp.int32)

    out = jax.block_until_ready(deepfm_forward(prep, x))
    assert out.shape == (B,)

    # Bit-for-bit-ish check against a pure-JAX path with identical folding/casts.
    matched = jax.block_until_ready(deepfm_reference_matched(prep, x))
    np.testing.assert_allclose(np.asarray(out), np.asarray(matched),
                               rtol=1e-4, atol=1e-4)
    # Semantic check against the exact f32 reference (bf16 approximation slack).
    exact = jax.block_until_ready(deepfm_reference_f32(params, x))
    np.testing.assert_allclose(np.asarray(out), np.asarray(exact),
                               rtol=5e-3, atol=5e-3)
    print("KERNEL_OK")
</pallas_src>

<mosaic_0001>
module attributes {stable_mosaic.version = 11 : i64} {
  func.func @deepfm_kernel(%arg0: i32, %arg1: memref<16x32xbf16, #tpu.memory_space<vmem>>, %arg2: memref<16x1xf32, #tpu.memory_space<vmem>>, %arg3: memref<32x256xbf16, #tpu.memory_space<vmem>>, %arg4: memref<1x256xf32, #tpu.memory_space<vmem>>, %arg5: memref<256x128xbf16, #tpu.memory_space<vmem>>, %arg6: memref<1x128xf32, #tpu.memory_space<vmem>>, %arg7: memref<1x128xf32, #tpu.memory_space<vmem>>, %arg8: memref<16x1xf32, #tpu.memory_space<vmem>>) attributes {dimension_semantics = [#tpu.dimension_semantics<parallel>], iteration_bounds = array<i64: 1>, scalar_prefetch = 0 : i64, scratch_operands = 0 : i64, tpu.core_type = #tpu.core_type<tc>, window_params = [{transform_indices = @transform_0, window_bounds = array<i64: 16, 32>}, {transform_indices = @transform_1, window_bounds = array<i64: 16, 1>}, {pipeline_mode = #tpu.pipeline_mode<synchronous>, transform_indices = @transform_2, window_bounds = array<i64: 32, 256>}, {pipeline_mode = #tpu.pipeline_mode<synchronous>, transform_indices = @transform_3, window_bounds = array<i64: 1, 256>}, {pipeline_mode = #tpu.pipeline_mode<synchronous>, transform_indices = @transform_4, window_bounds = array<i64: 256, 128>}, {pipeline_mode = #tpu.pipeline_mode<synchronous>, transform_indices = @transform_5, window_bounds = array<i64: 1, 128>}, {pipeline_mode = #tpu.pipeline_mode<synchronous>, transform_indices = @transform_6, window_bounds = array<i64: 1, 128>}, {transform_indices = @transform_7, window_bounds = array<i64: 16, 1>}]} {
    %c0 = arith.constant 0 : index
    %c0_0 = arith.constant 0 : index
    %0 = vector.load %arg1[%c0, %c0_0] : memref<16x32xbf16, #tpu.memory_space<vmem>>, vector<16x32xbf16>
    %1 = arith.extf %0 : vector<16x32xbf16> to vector<16x32xf32>
    %2 = vector.extract_strided_slice %1 {offsets = [0, 0], sizes = [16, 8], strides = [1, 1]} : vector<16x32xf32> to vector<16x8xf32>
    %3 = vector.extract_strided_slice %1 {offsets = [0, 8], sizes = [16, 8], strides = [1, 1]} : vector<16x32xf32> to vector<16x8xf32>
    %4 = arith.addf %2, %3 : vector<16x8xf32>
    %5 = vector.extract_strided_slice %1 {offsets = [0, 16], sizes = [16, 8], strides = [1, 1]} : vector<16x32xf32> to vector<16x8xf32>
    %6 = arith.addf %4, %5 : vector<16x8xf32>
    %7 = vector.extract_strided_slice %1 {offsets = [0, 24], sizes = [16, 8], strides = [1, 1]} : vector<16x32xf32> to vector<16x8xf32>
    %8 = arith.addf %6, %7 : vector<16x8xf32>
    %9 = arith.mulf %8, %8 : vector<16x8xf32>
    %cst = arith.constant dense<0.000000e+00> : vector<16xf32>
    %10 = vector.multi_reduction <add>, %9, %cst [1] : vector<16x8xf32> to vector<16xf32>
    %11 = vector.shape_cast %10 : vector<16xf32> to vector<16x1xf32>
    %12 = arith.mulf %1, %1 : vector<16x32xf32>
    %cst_1 = arith.constant dense<0.000000e+00> : vector<16xf32>
    %13 = vector.multi_reduction <add>, %12, %cst_1 [1] : vector<16x32xf32> to vector<16xf32>
    %14 = vector.shape_cast %13 : vector<16xf32> to vector<16x1xf32>
    %15 = arith.subf %11, %14 : vector<16x1xf32>
    %cst_2 = arith.constant 5.000000e-01 : f32
    %16 = vector.broadcast %cst_2 : f32 to vector<16x1xf32>
    %17 = arith.mulf %16, %15 : vector<16x1xf32>
    %18 = arith.negf %17 : vector<16x1xf32>
    %19 = math.exp %18 : vector<16x1xf32>
    %cst_3 = arith.constant 1.000000e+00 : f32
    %20 = vector.broadcast %cst_3 : f32 to vector<16x1xf32>
    %21 = arith.addf %20, %19 : vector<16x1xf32>
    %22 = arith.divf %20, %21 : vector<16x1xf32>
    %c0_4 = arith.constant 0 : index
    %c0_5 = arith.constant 0 : index
    %23 = vector.load %arg3[%c0_4, %c0_5] : memref<32x256xbf16, #tpu.memory_space<vmem>>, vector<32x256xbf16>
    %cst_6 = arith.constant dense<0.000000e+00> : vector<16x256xf32>
    %24 = tpu.matmul %0, %23, %cst_6 {dimension_numbers = #tpu.dot_dimension_numbers<[1], [0], [0], [1], [0, 0, 1, 1], [], []>} : vector<16x32xbf16>, vector<32x256xbf16>, vector<16x256xf32> -> vector<16x256xf32>
    %c0_7 = arith.constant 0 : index
    %c0_8 = arith.constant 0 : index
    %25 = vector.load %arg4[%c0_7, %c0_8] : memref<1x256xf32, #tpu.memory_space<vmem>>, vector<1x256xf32>
    %26 = vector.broadcast %25 : vector<1x256xf32> to vector<16x256xf32>
    %27 = arith.addf %24, %26 : vector<16x256xf32>
    %cst_9 = arith.constant 0.000000e+00 : f32
    %28 = vector.broadcast %cst_9 : f32 to vector<16x256xf32>
    %29 = arith.maximumf %27, %28 : vector<16x256xf32>
    %30 = arith.truncf %29 : vector<16x256xf32> to vector<16x256xbf16>
    %c0_10 = arith.constant 0 : index
    %c0_11 = arith.constant 0 : index
    %31 = vector.load %arg5[%c0_10, %c0_11] : memref<256x128xbf16, #tpu.memory_space<vmem>>, vector<256x128xbf16>
    %cst_12 = arith.constant dense<0.000000e+00> : vector<16x128xf32>
    %32 = tpu.matmul %30, %31, %cst_12 {dimension_numbers = #tpu.dot_dimension_numbers<[1], [0], [0], [1], [0, 0, 1, 1], [], []>} : vector<16x256xbf16>, vector<256x128xbf16>, vector<16x128xf32> -> vector<16x128xf32>
    %c0_13 = arith.constant 0 : index
    %c0_14 = arith.constant 0 : index
    %33 = vector.load %arg6[%c0_13, %c0_14] : memref<1x128xf32, #tpu.memory_space<vmem>>, vector<1x128xf32>
    %34 = vector.broadcast %33 : vector<1x128xf32> to vector<16x128xf32>
    %35 = arith.addf %32, %34 : vector<16x128xf32>
    %cst_15 = arith.constant 0.000000e+00 : f32
    %36 = vector.broadcast %cst_15 : f32 to vector<16x128xf32>
    %37 = arith.maximumf %35, %36 : vector<16x128xf32>
    %c0_16 = arith.constant 0 : index
    %c0_17 = arith.constant 0 : index
    %38 = vector.load %arg7[%c0_16, %c0_17] : memref<1x128xf32, #tpu.memory_space<vmem>>, vector<1x128xf32>
    %39 = vector.broadcast %38 : vector<1x128xf32> to vector<16x128xf32>
    %40 = arith.mulf %37, %39 : vector<16x128xf32>
    %cst_18 = arith.constant dense<0.000000e+00> : vector<16xf32>
    %41 = vector.multi_reduction <add>, %40, %cst_18 [1] : vector<16x128xf32> to vector<16xf32>
    %42 = vector.shape_cast %41 : vector<16xf32> to vector<16x1xf32>
    %c0_19 = arith.constant 0 : index
    %c0_20 = arith.constant 0 : index
    %43 = vector.load %arg2[%c0_19, %c0_20] : memref<16x1xf32, #tpu.memory_space<vmem>>, vector<16x1xf32>
    %44 = arith.addf %43, %22 : vector<16x1xf32>
    %45 = arith.addf %44, %42 : vector<16x1xf32>
    %46 = arith.negf %45 : vector<16x1xf32>
    %47 = math.exp %46 : vector<16x1xf32>
    %cst_21 = arith.constant 1.000000e+00 : f32
    %48 = vector.broadcast %cst_21 : f32 to vector<16x1xf32>
    %49 = arith.addf %48, %47 : vector<16x1xf32>
    %50 = arith.divf %48, %49 : vector<16x1xf32>
    %c0_22 = arith.constant 0 : index
    %c0_23 = arith.constant 0 : index
    %51 = vector.load %arg8[%c0_22, %c0_23] : memref<16x1xf32, #tpu.memory_space<vmem>>, vector<16x1xf32>
    tpu.vector_store %arg8[%c0_22, %c0_23], %50 {strides = array<i32>} : memref<16x1xf32, #tpu.memory_space<vmem>>, vector<16x1xf32>,
    return
  }
  func.func @transform_0(%arg0: i32) -> (i32, i32) {
    %c0_i32 = arith.constant 0 : i32
    %c0_i32_0 = arith.constant 0 : i32
    return %arg0, %c0_i32 : i32, i32
  }
  func.func @transform_1(%arg0: i32) -> (i32, i32) {
    %c0_i32 = arith.constant 0 : i32
    %c0_i32_0 = arith.constant 0 : i32
    return %arg0, %c0_i32 : i32, i32
  }
  func.func @transform_2(%arg0: i32) -> (i32, i32) {
    %c0_i32 = arith.constant 0 : i32
    %c0_i32_0 = arith.constant 0 : i32
    %c0_i32_1 = arith.constant 0 : i32
    return %c0_i32, %c0_i32_0 : i32, i32
  }
  func.func @transform_3(%arg0: i32) -> (i32, i32) {
    %c0_i32 = arith.constant 0 : i32
    %c0_i32_0 = arith.constant 0 : i32
    %c0_i32_1 = arith.constant 0 : i32
    return %c0_i32, %c0_i32_0 : i32, i32
  }
  func.func @transform_4(%arg0: i32) -> (i32, i32) {
    %c0_i32 = arith.constant 0 : i32
    %c0_i32_0 = arith.constant 0 : i32
    %c0_i32_1 = arith.constant 0 : i32
    return %c0_i32, %c0_i32_0 : i32, i32
  }
  func.func @transform_5(%arg0: i32) -> (i32, i32) {
    %c0_i32 = arith.constant 0 : i32
    %c0_i32_0 = arith.constant 0 : i32
    %c0_i32_1 = arith.constant 0 : i32
    return %c0_i32, %c0_i32_0 : i32, i32
  }
  func.func @transform_6(%arg0: i32) -> (i32, i32) {
    %c0_i32 = arith.constant 0 : i32
    %c0_i32_0 = arith.constant 0 : i32
    %c0_i32_1 = arith.constant 0 : i32
    return %c0_i32, %c0_i32_0 : i32, i32
  }
  func.func @transform_7(%arg0: i32) -> (i32, i32) {
    %c0_i32 = arith.constant 0 : i32
    %c0_i32_0 = arith.constant 0 : i32
    return %arg0, %c0_i32 : i32, i32
  }
}

</mosaic_0001>

<bundles_post_ra>
// kernel: tpu_custom_call.1
= control target key start
LH: loop header
LB: loop body
LE: loop exit
PB: predicated region body
PF: predicated region fallthrough
CT: control target
= control target key end

     0   :  { %12 = vsyncpa [#allocation3], 0  ;;  %s700_s0 = inlined_call_operand.vmem [shape: bf16[16,32], index: 0, kind: input, shape index: {}]   ;;  %s701_s1 = inlined_call_operand.vmem [shape: f32[16,1], index: 1, kind: input, shape index: {}]   ;;  %s702_s2 = inlined_call_operand.hbm [shape: bf16[32,256], index: 2, kind: input, shape index: {}]   ;;  %s703_s3 = inlined_call_operand.vmem [shape: f32[1,256], index: 3, kind: input, shape index: {}]   ;;  %s704_s4 = inlined_call_operand.hbm [shape: bf16[256,128], index: 4, kind: input, shape index: {}]   ;;  %s705_s5 = inlined_call_operand.vmem [shape: f32[1,128], index: 5, kind: input, shape index: {}]   ;;  %s706_s6 = inlined_call_operand.vmem [shape: f32[1,128], index: 6, kind: input, shape index: {}]   ;;  %s707_s7 = inlined_call_operand.vmem [shape: f32[16,1], index: 7, kind: output, shape index: {}]  }
   0x1   :  { %13 = vsyncpa [#allocation5], 0  ;;  %s599_s24 = smov [#allocation2]   ;;  %s551_s28 = scalar_lea.hbm %s702_s2, 512 }
   0x2   :  { %s23_s25 = sshll.u32 %s599_s24, 4  ;;  %p552_p0 = scmp.ne.s32.totalorder %s702_s2, %s551_s28  ;;  %s24_s25 = int_to_ptr.vmem [resolvable:$true] %s23_s25 }
   0x3   :  { %p555_p1 = scmp.lt.u32.totalorder %s551_s28, %s702_s2 }
   0x5   :  { %p557_p2 = pnand %p555_p1, %p552_p0 }
   0x7   :  { %560 = shalt.err (!%p557_p2)
}
   0x8   :  { %s561_s10 = scalar_lea.vmem %s24_s25, 512  ;;  %p566_p4 = scmp.lt.s32.totalorder %s24_s25, %s24_s25 }
   0x9   :  { %p562_p3 = scmp.ne.s32.totalorder %s24_s25, %s561_s10  ;;  %p567_p5 = scmp.lt.s32.totalorder %s561_s10, %s561_s10 }
   0xb   :  { %p568_p6 = por %p567_p5, %p566_p4 }
   0xd   :  { %p569_p7 = pnand %p568_p6, %p562_p3 }
   0xf   :  { %572 = shalt.err (!%p569_p7)
}
  0x10   :  { %s600_s11 = smov 128   ;;  %s601_s12 = smov 8  }
  0x11   :  { %29 = dma.hbm_to_vmem [thread:$0]  %s702_s2, 512, %s24_s25, [#allocation3], %s600_s11, %s600_s11, %s601_s12  }
  0x12   :  { %s602_s15 = smov [#allocation4]   ;;  %s573_s19 = scalar_lea.hbm %s704_s4, 2048 }
  0x13   :  { %s37_s16 = sshll.u32 %s602_s15, 4  ;;  %p574_p8 = scmp.ne.s32.totalorder %s704_s4, %s573_s19  ;;  %s38_s16 = int_to_ptr.vmem [resolvable:$true] %s37_s16 }
  0x14   :  { %p577_p9 = scmp.lt.u32.totalorder %s573_s19, %s704_s4 }
  0x16   :  { %p579_p10 = pnand %p577_p9, %p574_p8 }
  0x18   :  { %582 = shalt.err (!%p579_p10)
}
  0x19   :  { %s583_s24 = scalar_lea.vmem %s38_s16, 2048  ;;  %p588_p12 = scmp.lt.s32.totalorder %s38_s16, %s38_s16 }
  0x1a   :  { %p584_p11 = scmp.ne.s32.totalorder %s38_s16, %s583_s24  ;;  %p589_p13 = scmp.lt.s32.totalorder %s583_s24, %s583_s24 }
  0x1c   :  { %p590_p0 = por %p589_p13, %p588_p12 }
  0x1e   :  { %p591_p1 = pnand %p590_p0, %p584_p11 }
  0x20   :  { %594 = shalt.err (!%p591_p1)
}
  0x21   :  { %s603_s2 = smov 64   ;;  %s604_s25 = smov 4  }
  0x22   :  { %43 = dma.hbm_to_vmem [thread:$0]  %s704_s4, 2048, %s38_s16, [#allocation5], %s603_s2, %s603_s2, %s604_s25  }
  0x23   :  { %595 = dma.done.wait [#allocation3], 512  }
  0x24   :  { %596 = vsyncadd [#allocation3], 4294966784 }
  0x25   :  { %597 = dma.done.wait [#allocation5], 2048  }
  0x26   :  { %598 = vsyncadd [#allocation5], 4294965248  ;;  %v605_v0 = vmov 0   ;;  %v505_v1 = vld [vmem:[#allocation2 + $0x4] ss:$8 sps:$4 sm:$0xff]   ;;  %vm96_vm0 = vcmask 261120   ;;  %v125_v25 = vlaneseq }
  0x27   :  { %195 = vmatprep.mubr.bf16.mxu0 %v605_v0  ;;  %v507_v2 = vld [vmem:[#allocation2] ss:$8 sps:$4 sm:$0xff]   ;;  %163 = vmatprep.subr.bf16.mxu0 %v505_v1  ;;  %v508_v3 = vld [vmem:[#allocation2 + $0x14] ss:$8 sps:$4 sm:$0xff]   ;;  %v510_v4 = vld [vmem:[#allocation2 + $0x10] ss:$8 sps:$4 sm:$0xff]  }
  0x28   :  { %v55_v5 = vld [vmem:[%s700_s0] sm:$0xff]   ;;  %164 = vmatpush1.bf16.msra.mxu0 %v507_v2  ;;  %v514_v8 = vld [vmem:[#allocation4 + $0x48] sm:$0xff]   ;;  %v516_v10 = vld [vmem:[#allocation4 + $0x50] sm:$0xff]   ;;  %s606_s0 = smov 120   ;;  %s607_s4 = smov 104   ;;  %v126_v26 = vshrl.u32 %v125_v25, 7 }
  0x29   :  { %v512_v6 = vld [vmem:[#allocation4 + $0x40] sm:$0xff]   ;;  %165 = vmatprep.subr.bf16.mxu0 %v508_v3  ;;  %v515_v9 = vld [vmem:[#allocation4 + $0x8] sm:$0xff]   ;;  %v517_v11 = vld [vmem:[#allocation4 + $0x10] sm:$0xff]   ;;  %v57_v22 = vunpack.c.l.bf16 %v55_v5  ;;  %v58_v23 = vunpack.c.h.bf16 %v55_v5  ;;  %s608_s30 = smov 112   ;;  %vm87_vm1 = vcmask 64512   ;;  %vm421_vm2 = vcmask 7168  }
  0x2a   :  { %v513_v7 = vld [vmem:[#allocation4] sm:$0xff]   ;;  %458 = vmatprep.subr.bf16.mxu1 %v512_v6  ;;  %v518_v12 = vld [vmem:[#allocation4 + $0x58] sm:$0xff]   ;;  %v522_v16 = vld [vmem:[#allocation4 + $0x68] sm:$0xff]   ;;  %v127_v27 = vsub.s32 0, %v126_v26  ;;  %v131_v29 = vsub.s32 1, %v126_v26 }
  0x2b   :  { %459 = vmatpush3.bf16.msra.mxu1 %v513_v7  ;;  %v519_v13 = vld [vmem:[#allocation4 + $0x18] sm:$0xff]   ;;  %v520_v14 = vld [vmem:[#allocation4 + $0x60] sm:$0xff]   ;;  %v523_v17 = vld [vmem:[#allocation4 + $0x28] sm:$0xff]   ;;  %v490_v24 = vpack.i.bf16 %v58_v23, %v57_v22  ;;  %v95_v57 = vmul.f32 %v58_v23, %v58_v23  ;;  %v94_v58 = vmul.f32 %v57_v22, %v57_v22 }
  0x2c   :  { %166 = vmatpush1.bf16.msra.mxu0 %v510_v4  ;;  %460 = vmatprep.subr.bf16.mxu1 %v514_v8  ;;  %v521_v15 = vld [vmem:[#allocation4 + $0x20] sm:$0xff]   ;;  %v524_v18 = vld [vmem:[#allocation4 + $0x70] sm:$0xff]   ;;  %v526_v20 = vld [vmem:[#allocation4 + $0x78] sm:$0xff]  }
  0x2d   :  { %v525_v19 = vld [vmem:[#allocation4 + $0x30] sm:$0xff]   ;;  %v527_v21 = vld [vmem:[#allocation4 + $0x38] sm:$0xff]   ;;  %491 = vrot.lane.b32.xlu0 %v490_v24, %s606_s0  ;;  %501 = vrot.lane.b32.xlu1 %v490_v24, %s607_s4  ;;  %v123_v28 = vld [vmem:[%s703_s3] sm:$0x3]  ;;  %v100_v61 = vsel %vm96_vm0, %v95_v57, 0.0  ;;  %v97_v62 = vsel %vm96_vm0, %v94_v58, 0.0 }
  0x2e   :  { %v128_v30 = vrot.slane %v123_v28, %v127_v27  ;;  %v132_v31 = vrot.slane %v123_v28, %v131_v29  ;;  %v438_v0 = vld [vmem:[%s705_s5] ss:$0 sm:$0xff] }
  0x2f   :  { %437 = vmatmul.mubr.msk.bf16.vlgmr.msra.gmra.mrb[0].mxu0 %vm96_vm0, %v55_v5  ;;  %461 = vmatpush3.bf16.msra.mxu1 %v515_v9  ;;  %v455_v7 = vld [vmem:[%s706_s6] ss:$0 sm:$0xff] }
  0x30   :  { %462 = vmatprep.subr.bf16.mxu1 %v516_v10  ;;  %v403_v28 = vld [vmem:[%s701_s1] sm:$0xff] }
  0x31   :  { %496 = vrot.lane.b32.xlu0 %v490_v24, %s608_s30 }
  0x33   :  { %463 = vmatpush3.bf16.msra.mxu1 %v517_v11 }
  0x34   :  { %464 = vmatprep.subr.bf16.mxu1 %v518_v12 }
  0x37   :  { %465 = vmatpush3.bf16.msra.mxu1 %v519_v13 }
  0x38   :  { %466 = vmatprep.subr.bf16.mxu1 %v520_v14 }
  0x3b   :  { %467 = vmatpush3.bf16.msra.mxu1 %v521_v15 }
  0x3c   :  { %468 = vmatprep.subr.bf16.mxu1 %v522_v16 }
  0x3f   :  { %469 = vmatpush3.bf16.msra.mxu1 %v523_v17 }
  0x40   :  { %470 = vmatprep.subr.bf16.mxu1 %v524_v18 }
  0x43   :  { %471 = vmatpush3.bf16.msra.mxu1 %v525_v19 }
  0x44   :  { %472 = vmatprep.subr.bf16.mxu1 %v526_v20 }
  0x47   :  { %473 = vmatpush3.bf16.msra.mxu1 %v527_v21 }
  0x9f   :  { %v492_v32 = vpop.permute.xlu0 %491  ;;  %v502_v34 = vpop.permute.xlu1 %501 }
  0xa0   :  { %v545_v39 = vadd.high.f32.bf16 %v58_v23, %v492_v32  ;;  %v546_v40 = vadd.low.f32.bf16 %v57_v22, %v492_v32 }
  0xa3   :  { %v497_v43 = vpop.permute.xlu0 %496 }
  0xa4   :  { %v547_v49 = vadd.low.f32.bf16 %v546_v40, %v497_v43  ;;  %v548_v50 = vadd.high.f32.bf16 %v545_v39, %v497_v43 }
  0xa6   :  { %v549_v53 = vadd.high.f32.bf16 %v548_v50, %v502_v34  ;;  %v550_v54 = vadd.low.f32.bf16 %v547_v49, %v502_v34 }
  0xa8   :  { %v86_v55 = vmul.f32 %v549_v53, %v549_v53  ;;  %v85_v56 = vmul.f32 %v550_v54, %v550_v54 }
  0xaa   :  { %v91_v59 = vsel %vm87_vm1, %v86_v55, 0.0  ;;  %v88_v60 = vsel %vm87_vm1, %v85_v56, 0.0 }
  0xab   :  { %92 = vadd.xlane.f32.xlu0 %v91_v59  ;;  %89 = vadd.xlane.f32.xlu1 %v88_v60 }
  0xaf   :  { %101 = vadd.xlane.f32.xlu1 %v100_v61  ;;  %98 = vadd.xlane.f32.xlu0 %v97_v62 }
 0x102   :  { %v197_v33 = vpop.f32.mrb[0].mxu0 }
 0x103   :  { %v198_v35 = vadd.f32 %v197_v33, %v128_v30  ;;  %v199_v36 = vpop.f32.mrb[1].mxu0 }
 0x104   :  { %v200_v37 = vadd.f32 %v199_v36, %v132_v31  ;;  %v201_v38 = vpop.f32.mrb[2].mxu0 }
 0x105   :  { %v202_v41 = vadd.f32 %v201_v38, %v128_v30  ;;  %v203_v42 = vpop.f32.mrb[3].mxu0  ;;  %v206_v45 = vmax.f32 %v198_v35, 0.0  ;;  %v404_v30 = vld [vmem:[%s701_s1 + $0x8] sm:$0xff] }
 0x106   :  { %v204_v44 = vadd.f32 %v203_v42, %v132_v31  ;;  %v207_v47 = vmax.f32 %v200_v37, 0.0 }
 0x107   :  { %v208_v46 = vmax.f32 %v202_v41, 0.0 }
 0x108   :  { %v209_v48 = vmax.f32 %v204_v44, 0.0 }
 0x109   :  { %v210_v51 = vpack.c.bf16 %v208_v46, %v206_v45 }
 0x10a   :  { %v211_v52 = vpack.c.bf16 %v209_v48, %v207_v47 }
 0x10c   :  { %379 = vmatprep.mubr.bf16.mxu1 %v211_v52 }
 0x10d   :  { %380 = vmatmul.mubr.bf16.vlgmr.msra.gmra.mrb[0].mxu1 %v210_v51 }
 0x138   :  { %v93_v13 = vpop.xlane.xlu0 %92  ;;  %v90_v14 = vpop.xlane.xlu1 %89 }
 0x13c   :  { %v99_v15 = vpop.xlane.xlu0 %98  ;;  %v102_v16 = vpop.xlane.xlu1 %101 }
 0x13d   :  { %v103_v17 = vsub.f32 %v90_v14, %v99_v15  ;;  %v104_v18 = vsub.f32 %v93_v13, %v102_v16 }
 0x13f   :  { %v430_v19 = vmul.f32 -0.5, %v103_v17  ;;  %v431_v20 = vmul.f32 -0.5, %v104_v18 }
 0x141   :  { %v109_v21 = vmul.f32 1.442695, %v430_v19  ;;  %v111_v22 = vmul.f32 1.442695, %v431_v20 }
 0x143   :  { %529 = vpow2.f32 %v109_v21 }
 0x144   :  { %531 = vpow2.f32 %v111_v22 }
 0x14d   :  { %v530_v23 = vpop.eup %529 }
 0x14e   :  { %v532_v24 = vpop.eup %531  ;;  %v113_v25 = vadd.f32 1.0, %v530_v23 }
 0x14f   :  { %v114_v26 = vadd.f32 1.0, %v532_v24 }
 0x150   :  { %533 = vrcp.f32 %v113_v25 }
 0x151   :  { %535 = vrcp.f32 %v114_v26 }
 0x15a   :  { %v534_v27 = vpop.eup %533 }
 0x15b   :  { %v536_v29 = vpop.eup %535  ;;  %v405_v31 = vadd.f32 %v534_v27, %v403_v28 }
 0x15c   :  { %v406_v34 = vadd.f32 %v536_v29, %v404_v30 }
 0x1e0   :  { %v474_v63 = vpop.f32.mrb[0].mxu1 }
 0x1e1   :  { %v475_v1 = vpop.f32.mrb[1].mxu1 }
 0x1e2   :  { %v476_v2 = vadd.f32 %v475_v1, %v474_v63  ;;  %v477_v3 = vpop.f32.mrb[2].mxu1 }
 0x1e3   :  { %v478_v4 = vpop.f32.mrb[3].mxu1 }
 0x1e4   :  { %v382_v5 = vadd.f32 %v476_v2, %v438_v0  ;;  %v479_v6 = vadd.f32 %v478_v4, %v477_v3 }
 0x1e6   :  { %v388_v8 = vmax.f32 %v382_v5, 0.0  ;;  %v385_v9 = vadd.f32 %v479_v6, %v438_v0 }
 0x1e8   :  { %v389_v10 = vmax.f32 %v385_v9, 0.0  ;;  %v397_v11 = vmul.f32 %v455_v7, %v388_v8 }
 0x1ea   :  { %399 = vadd.xlane.f32.xlu0 %v397_v11  ;;  %v398_v12 = vmul.f32 %v455_v7, %v389_v10 }
 0x1ec   :  { %401 = vadd.xlane.f32.xlu1 %v398_v12 }
 0x277   :  { %v400_v32 = vpop.xlane.xlu0 %399 }
 0x278   :  { %v407_v33 = vadd.f32 %v405_v31, %v400_v32 }
 0x279   :  { %v402_v35 = vpop.xlane.xlu1 %401 }
 0x27a   :  { %v456_v36 = vmul.f32 -1.442695, %v407_v33  ;;  %v408_v37 = vadd.f32 %v406_v34, %v402_v35 }
 0x27c   :  { %537 = vpow2.f32 %v456_v36  ;;  %v457_v38 = vmul.f32 -1.442695, %v408_v37 }
 0x27e   :  { %539 = vpow2.f32 %v457_v38 }
 0x286   :  { %v538_v39 = vpop.eup %537 }
 0x287   :  { %v415_v40 = vadd.f32 1.0, %v538_v39 }
 0x288   :  { %v540_v41 = vpop.eup %539 }
 0x289   :  { %541 = vrcp.f32 %v415_v40  ;;  %v416_v42 = vadd.f32 1.0, %v540_v41 }
 0x28b   :  { %543 = vrcp.f32 %v416_v42 }
 0x293   :  { %v542_v43 = vpop.eup %541 }
 0x294   :  { %422 = vst.msk [vmem:[%s707_s7] sm:$0xff] %vm421_vm2, %v542_v43 }
 0x295   :  { %v544_v44 = vpop.eup %543 }
 0x296   :  { %423 = vst.msk [vmem:[%s707_s7 + $0x8] sm:$0xff] %vm421_vm2, %v544_v44 }
 0x297   :  { %428 = vsyncpa [#allocation3], 1 }
 0x298   :  { %429 = vsyncpa [#allocation5], 1 }

</bundles_post_ra>
